<compile_context>
chip_gen: v7x
topology: tpu7x:2x2x1
jax: 0.10.0
libtpu: 0.0.40
codegen_flags: <defaults>
</compile_context>

<pallas_src>
import functools

import jax
import jax.numpy as jnp
from jax.experimental import pallas as pl
from jax.experimental.pallas import tpu as pltpu

LANE = 128
SUBLANE = 8


def _round_up(x, m):
    return (x + m - 1) // m * m


# ---------------------------------------------------------------------------
# Kernel: one fused matmul, elementwise epilogue.
# ---------------------------------------------------------------------------
def _shell_core_kernel(x_ref, mem_ref, wf_ref, bf_ref, bhn_ref, out_ref, *, dp):
    x = x_ref[...]                                                    # (TB, Dp)

    # Single MXU push: [logic | r_pre | z_pre | n_pre | ethics_pre]  -> (TB, 5*Dp)
    fused = jnp.dot(x, wf_ref[...],
                    preferred_element_type=jnp.float32) + bf_ref[...]

    logic = fused[:, 0 * dp:1 * dp]
    r = jax.nn.sigmoid(fused[:, 1 * dp:2 * dp])
    z = jax.nn.sigmoid(fused[:, 2 * dp:3 * dp])
    n = jnp.tanh(fused[:, 3 * dp:4 * dp] + r * bhn_ref[...])
    emotion = (1.0 - z) * n                                           # (TB, Dp)

    # ethics head was folded into the last fused block; its logit lives in lane 0.
    ethics = jax.nn.sigmoid(fused[:, 4 * dp:4 * dp + 1])              # (TB, 1)

    out_ref[...] = logic + emotion + ethics + mem_ref[...]


# ---------------------------------------------------------------------------
# Parameter packing: fuse + pad weights / biases once (wrapper side).
# ---------------------------------------------------------------------------
def pack_params(p, trait_dim):
    """Build the fused (Dp, 5*Dp) weight, (1, 5*Dp) bias and padded b_hn."""
    d = trait_dim
    dp = _round_up(max(d, LANE), LANE)

    def pad_w(w):   # (d, d) -> (dp, dp)
        return jnp.pad(w, ((0, dp - d), (0, dp - d)))

    def pad_b(b):   # (1, d) -> (1, dp)
        return jnp.pad(b, ((0, 0), (0, dp - d)))

    # Fold ethics head into the matmul: logic @ weth^T + beth
    #   = x @ (wl_t @ weth^T) + (bl @ weth^T + beth)
    eth_col = p["wl_t"] @ p["weth"].T                       # (d, 1)
    eth_bias = p["bl"] @ p["weth"].T + p["beth"]            # (1, 1)
    w_eth_blk = jnp.zeros((dp, dp), jnp.float32).at[:d, 0:1].set(eth_col)
    b_eth_blk = jnp.zeros((1, dp), jnp.float32).at[:, 0:1].set(eth_bias)

    wf = jnp.concatenate(
        [pad_w(p["wl_t"]), pad_w(p["wir_t"]), pad_w(p["wiz_t"]),
         pad_w(p["win_t"]), w_eth_blk], axis=1)                       # (Dp, 5*Dp)
    bf = jnp.concatenate(
        [pad_b(p["bl"]),
         pad_b(p["bir"] + p["bhr"]),        # r bias pre-folded
         pad_b(p["biz"] + p["bhz"]),        # z bias pre-folded
         pad_b(p["bin"]),
         b_eth_blk], axis=1)                                          # (1, 5*Dp)
    bhn_p = pad_b(p["bhn"])                                           # (1, Dp)

    # TODO(synk): for large trait_dim, store wf resident in bf16 (or tile the 5*Dp axis)
    # to fit the 64 MiB VMEM on v7x; f32 residency is fine at the shipped sizes.
    return {"wf": wf, "bf": bf, "bhn": bhn_p, "d": d, "dp": dp}


# ---------------------------------------------------------------------------
# Wrapper: pad activations, 1-D batch grid, weights VMEM-resident.
# ---------------------------------------------------------------------------
def shell_core_forward(traits, memory_bias, packed, *, block_b=256):
    b, d = traits.shape
    dp = packed["dp"]
    assert packed["d"] == d

    tb = min(block_b, _round_up(b, SUBLANE))      # batch tile (multiple of 8)
    bp = _round_up(b, tb)

    traits_p = jnp.pad(traits, ((0, bp - b), (0, dp - d)))
    mem_p = jnp.pad(memory_bias, ((0, bp - b), (0, dp - d)))

    kernel = functools.partial(_shell_core_kernel, dp=dp)

    out_p = pl.pallas_call(
        kernel,
        out_shape=jax.ShapeDtypeStruct((bp, dp), jnp.float32),
        grid_spec=pltpu.PrefetchScalarGridSpec(
            num_scalar_prefetch=0,
            grid=(bp // tb,),
            in_specs=[
                pl.BlockSpec((tb, dp), lambda i: (i, 0)),        # traits tile
                pl.BlockSpec((tb, dp), lambda i: (i, 0)),        # memory_bias tile
                pl.BlockSpec((dp, 5 * dp), lambda i: (0, 0)),    # fused weight (resident)
                pl.BlockSpec((1, 5 * dp), lambda i: (0, 0)),     # fused bias   (resident)
                pl.BlockSpec((1, dp), lambda i: (0, 0)),         # b_hn         (resident)
            ],
            out_specs=pl.BlockSpec((tb, dp), lambda i: (i, 0)),
        ),
        compiler_params=pltpu.CompilerParams(
            dimension_semantics=("parallel",),      # megacore sharding on v7x
            vmem_limit_bytes=64 << 20,              # raise scoped VMEM for big tiles
        ),
    )(traits_p, mem_p, packed["wf"], packed["bf"], packed["bhn"])

    return out_p[:b, :d]


# ---------------------------------------------------------------------------
# Parameter init (PyTorch-shaped, pre-transposed to (in, out)) + pure-JAX reference.
# ---------------------------------------------------------------------------
def init_params(key, trait_dim):
    ks = jax.random.split(key, 8)
    d = trait_dim
    bound = 1.0 / jnp.sqrt(d)

    w_logic = jax.random.uniform(ks[0], (d, d), jnp.float32, -bound, bound)
    b_logic = jax.random.uniform(ks[1], (d,), jnp.float32, -bound, bound)

    # GRU(d, d): weight_ih_l0 (3d, d), bias_ih_l0 (3d,), bias_hh_l0 (3d,)
    # (weight_hh_l0 multiplies h0 == 0 and never contributes; omitted.)
    w_ih = jax.random.uniform(ks[2], (3 * d, d), jnp.float32, -bound, bound)
    b_ih = jax.random.uniform(ks[3], (3 * d,), jnp.float32, -bound, bound)
    b_hh = jax.random.uniform(ks[4], (3 * d,), jnp.float32, -bound, bound)

    w_eth = jax.random.uniform(ks[5], (1, d), jnp.float32, -bound, bound)
    b_eth = jax.random.uniform(ks[6], (1,), jnp.float32, -bound, bound)

    w_ir, w_iz, w_in = w_ih[:d], w_ih[d:2 * d], w_ih[2 * d:]
    return {
        "wl_t": w_logic.T, "bl": b_logic.reshape(1, d),
        "wir_t": w_ir.T, "wiz_t": w_iz.T, "win_t": w_in.T,
        "bir": b_ih[:d].reshape(1, d),
        "biz": b_ih[d:2 * d].reshape(1, d),
        "bin": b_ih[2 * d:].reshape(1, d),
        "bhr": b_hh[:d].reshape(1, d),
        "bhz": b_hh[d:2 * d].reshape(1, d),
        "bhn": b_hh[2 * d:].reshape(1, d),
        "weth": w_eth, "beth": b_eth.reshape(1, 1),
    }


def shell_core_reference(traits, memory_bias, p):
    logic = traits @ p["wl_t"] + p["bl"]
    r = jax.nn.sigmoid(traits @ p["wir_t"] + p["bir"] + p["bhr"])
    z = jax.nn.sigmoid(traits @ p["wiz_t"] + p["biz"] + p["bhz"])
    n = jnp.tanh(traits @ p["win_t"] + p["bin"] + r * p["bhn"])
    emotion = (1.0 - z) * n
    ethics = jax.nn.sigmoid(jnp.sum(logic * p["weth"], axis=-1, keepdims=True) + p["beth"])
    return logic + emotion + ethics + memory_bias


if __name__ == "__main__":
    trait_dim = 12
    batch = 4

    key = jax.random.PRNGKey(0)
    k_tr, k_mb, k_par = jax.random.split(key, 3)

    traits = jax.random.normal(k_tr, (batch, trait_dim), jnp.float32)
    memory_bias = jax.random.normal(k_mb, (batch, trait_dim), jnp.float32)
    params = init_params(k_par, trait_dim)
    packed = pack_params(params, trait_dim)

    out = shell_core_forward(traits, memory_bias, packed)
    out = jax.block_until_ready(out)

    ref = shell_core_reference(traits, memory_bias, params)
    assert out.shape == (batch, trait_dim)
    assert jnp.allclose(out, ref, atol=1e-4, rtol=1e-4), "mismatch vs reference"

    print("KERNEL_OK")
</pallas_src>

<mosaic_0001>
module attributes {stable_mosaic.version = 11 : i64} {
  func.func @_shell_core_kernel(%arg0: i32, %arg1: memref<8x128xf32, #tpu.memory_space<vmem>>, %arg2: memref<8x128xf32, #tpu.memory_space<vmem>>, %arg3: memref<128x640xf32, #tpu.memory_space<vmem>>, %arg4: memref<1x640xf32, #tpu.memory_space<vmem>>, %arg5: memref<1x128xf32, #tpu.memory_space<vmem>>, %arg6: memref<8x128xf32, #tpu.memory_space<vmem>>) attributes {dimension_semantics = [#tpu.dimension_semantics<parallel>], iteration_bounds = array<i64: 1>, scalar_prefetch = 0 : i64, scratch_operands = 0 : i64, tpu.core_type = #tpu.core_type<tc>, window_params = [{transform_indices = @transform_0, window_bounds = array<i64: 8, 128>}, {transform_indices = @transform_1, window_bounds = array<i64: 8, 128>}, {pipeline_mode = #tpu.pipeline_mode<synchronous>, transform_indices = @transform_2, window_bounds = array<i64: 128, 640>}, {pipeline_mode = #tpu.pipeline_mode<synchronous>, transform_indices = @transform_3, window_bounds = array<i64: 1, 640>}, {pipeline_mode = #tpu.pipeline_mode<synchronous>, transform_indices = @transform_4, window_bounds = array<i64: 1, 128>}, {transform_indices = @transform_5, window_bounds = array<i64: 8, 128>}]} {
    %c0 = arith.constant 0 : index
    %c0_0 = arith.constant 0 : index
    %0 = vector.load %arg1[%c0, %c0_0] : memref<8x128xf32, #tpu.memory_space<vmem>>, vector<8x128xf32>
    %c0_1 = arith.constant 0 : index
    %c0_2 = arith.constant 0 : index
    %1 = vector.load %arg3[%c0_1, %c0_2] : memref<128x640xf32, #tpu.memory_space<vmem>>, vector<128x640xf32>
    %cst = arith.constant dense<0.000000e+00> : vector<8x640xf32>
    %2 = tpu.matmul %0, %1, %cst {dimension_numbers = #tpu.dot_dimension_numbers<[1], [0], [0], [1], [0, 0, 1, 1], [], []>} : vector<8x128xf32>, vector<128x640xf32>, vector<8x640xf32> -> vector<8x640xf32>
    %c0_3 = arith.constant 0 : index
    %c0_4 = arith.constant 0 : index
    %3 = vector.load %arg4[%c0_3, %c0_4] : memref<1x640xf32, #tpu.memory_space<vmem>>, vector<1x640xf32>
    %4 = vector.broadcast %3 : vector<1x640xf32> to vector<8x640xf32>
    %5 = arith.addf %2, %4 : vector<8x640xf32>
    %6 = vector.extract_strided_slice %5 {offsets = [0, 0], sizes = [8, 128], strides = [1, 1]} : vector<8x640xf32> to vector<8x128xf32>
    %7 = vector.extract_strided_slice %5 {offsets = [0, 128], sizes = [8, 128], strides = [1, 1]} : vector<8x640xf32> to vector<8x128xf32>
    %8 = arith.negf %7 : vector<8x128xf32>
    %9 = math.exp %8 : vector<8x128xf32>
    %cst_5 = arith.constant 1.000000e+00 : f32
    %10 = vector.broadcast %cst_5 : f32 to vector<8x128xf32>
    %11 = arith.addf %10, %9 : vector<8x128xf32>
    %12 = arith.divf %10, %11 : vector<8x128xf32>
    %13 = vector.extract_strided_slice %5 {offsets = [0, 256], sizes = [8, 128], strides = [1, 1]} : vector<8x640xf32> to vector<8x128xf32>
    %14 = arith.negf %13 : vector<8x128xf32>
    %15 = math.exp %14 : vector<8x128xf32>
    %cst_6 = arith.constant 1.000000e+00 : f32
    %16 = vector.broadcast %cst_6 : f32 to vector<8x128xf32>
    %17 = arith.addf %16, %15 : vector<8x128xf32>
    %18 = arith.divf %16, %17 : vector<8x128xf32>
    %19 = vector.extract_strided_slice %5 {offsets = [0, 384], sizes = [8, 128], strides = [1, 1]} : vector<8x640xf32> to vector<8x128xf32>
    %c0_7 = arith.constant 0 : index
    %c0_8 = arith.constant 0 : index
    %20 = vector.load %arg5[%c0_7, %c0_8] : memref<1x128xf32, #tpu.memory_space<vmem>>, vector<1x128xf32>
    %21 = vector.broadcast %20 : vector<1x128xf32> to vector<8x128xf32>
    %22 = arith.mulf %12, %21 : vector<8x128xf32>
    %23 = arith.addf %19, %22 : vector<8x128xf32>
    %24 = math.tanh %23 : vector<8x128xf32>
    %cst_9 = arith.constant 1.000000e+00 : f32
    %25 = vector.broadcast %cst_9 : f32 to vector<8x128xf32>
    %26 = arith.subf %25, %18 : vector<8x128xf32>
    %27 = arith.mulf %26, %24 : vector<8x128xf32>
    %28 = vector.extract_strided_slice %5 {offsets = [0, 512], sizes = [8, 1], strides = [1, 1]} : vector<8x640xf32> to vector<8x1xf32>
    %29 = arith.negf %28 : vector<8x1xf32>
    %30 = math.exp %29 : vector<8x1xf32>
    %cst_10 = arith.constant 1.000000e+00 : f32
    %31 = vector.broadcast %cst_10 : f32 to vector<8x1xf32>
    %32 = arith.addf %31, %30 : vector<8x1xf32>
    %33 = arith.divf %31, %32 : vector<8x1xf32>
    %34 = arith.addf %6, %27 : vector<8x128xf32>
    %35 = vector.broadcast %33 : vector<8x1xf32> to vector<8x128xf32>
    %36 = arith.addf %34, %35 : vector<8x128xf32>
    %c0_11 = arith.constant 0 : index
    %c0_12 = arith.constant 0 : index
    %37 = vector.load %arg2[%c0_11, %c0_12] : memref<8x128xf32, #tpu.memory_space<vmem>>, vector<8x128xf32>
    %38 = arith.addf %36, %37 : vector<8x128xf32>
    %c0_13 = arith.constant 0 : index
    %c0_14 = arith.constant 0 : index
    %39 = vector.load %arg6[%c0_13, %c0_14] : memref<8x128xf32, #tpu.memory_space<vmem>>, vector<8x128xf32>
    tpu.vector_store %arg6[%c0_13, %c0_14], %38 {strides = array<i32>} : memref<8x128xf32, #tpu.memory_space<vmem>>, vector<8x128xf32>,
    return
  }
  func.func @transform_0(%arg0: i32) -> (i32, i32) {
    %c0_i32 = arith.constant 0 : i32
    %c0_i32_0 = arith.constant 0 : i32
    return %arg0, %c0_i32 : i32, i32
  }
  func.func @transform_1(%arg0: i32) -> (i32, i32) {
    %c0_i32 = arith.constant 0 : i32
    %c0_i32_0 = arith.constant 0 : i32
    return %arg0, %c0_i32 : i32, i32
  }
  func.func @transform_2(%arg0: i32) -> (i32, i32) {
    %c0_i32 = arith.constant 0 : i32
    %c0_i32_0 = arith.constant 0 : i32
    %c0_i32_1 = arith.constant 0 : i32
    return %c0_i32, %c0_i32_0 : i32, i32
  }
  func.func @transform_3(%arg0: i32) -> (i32, i32) {
    %c0_i32 = arith.constant 0 : i32
    %c0_i32_0 = arith.constant 0 : i32
    %c0_i32_1 = arith.constant 0 : i32
    return %c0_i32, %c0_i32_0 : i32, i32
  }
  func.func @transform_4(%arg0: i32) -> (i32, i32) {
    %c0_i32 = arith.constant 0 : i32
    %c0_i32_0 = arith.constant 0 : i32
    %c0_i32_1 = arith.constant 0 : i32
    return %c0_i32, %c0_i32_0 : i32, i32
  }
  func.func @transform_5(%arg0: i32) -> (i32, i32) {
    %c0_i32 = arith.constant 0 : i32
    %c0_i32_0 = arith.constant 0 : i32
    return %arg0, %c0_i32 : i32, i32
  }
}

</mosaic_0001>

<bundles_post_ra>
// kernel: tpu_custom_call.1
= control target key start
LH: loop header
LB: loop body
LE: loop exit
PB: predicated region body
PF: predicated region fallthrough
CT: control target
= control target key end

     0   :  { %10 = vsyncpa [#allocation3], 0  ;;  %s893_s0 = inlined_call_operand.hbm [shape: f32[8,128], index: 0, kind: input, shape index: {}]   ;;  %s894_s1 = inlined_call_operand.hbm [shape: f32[8,128], index: 1, kind: input, shape index: {}]   ;;  %s895_s2 = inlined_call_operand.hbm [shape: f32[128,640], index: 2, kind: input, shape index: {}]   ;;  %s896_s3 = inlined_call_operand.hbm [shape: f32[1,640], index: 3, kind: input, shape index: {}]   ;;  %s897_s4 = inlined_call_operand.hbm [shape: f32[1,128], index: 4, kind: input, shape index: {}]   ;;  %s898_s5 = inlined_call_operand.hbm [shape: f32[8,128], index: 5, kind: output, shape index: {}]  }
   0x1   :  { %11 = vsyncpa [#allocation6], 0 }
   0x2   :  { %12 = vsyncpa [#allocation9], 0 }
   0x3   :  { %13 = vsyncpa [#allocation4], 0  ;;  %s769_s18 = smov [#allocation5]   ;;  %s770_s20 = smov [#allocation8]  }
   0x4   :  { %s30_s19 = sshll.u32 %s769_s18, 4  ;;  %s52_s21 = sshll.u32 %s770_s20, 4  ;;  %s31_s19 = int_to_ptr.vmem [resolvable:$true] %s30_s19  ;;  %s53_s21 = int_to_ptr.vmem [resolvable:$true] %s52_s21 }
   0x5   :  { %s629_s24 = scalar_lea.hbm %s894_s1, 128 }
   0x6   :  { %p630_p0 = scmp.ne.s32.totalorder %s894_s1, %s629_s24  ;;  %p633_p1 = scmp.lt.u32.totalorder %s629_s24, %s894_s1 }
   0x8   :  { %p635_p2 = pnand %p633_p1, %p630_p0 }
   0xa   :  { %638 = shalt.err (!%p635_p2)
}
   0xb   :  { %s639_s29 = scalar_lea.vmem %s31_s19, 128  ;;  %p644_p4 = scmp.lt.s32.totalorder %s31_s19, %s31_s19 }
   0xc   :  { %p640_p3 = scmp.ne.s32.totalorder %s31_s19, %s639_s29  ;;  %p645_p5 = scmp.lt.s32.totalorder %s639_s29, %s639_s29 }
   0xe   :  { %p646_p6 = por %p645_p5, %p644_p4 }
  0x10   :  { %p647_p7 = pnand %p646_p6, %p640_p3 }
  0x12   :  { %650 = shalt.err (!%p647_p7)
}
  0x13   :  { %33 = dma.hbm_to_vmem [thread:$0]  %s894_s1, 128, %s31_s19, [#allocation6]  }
  0x14   :  { %s651_s9 = scalar_lea.hbm %s896_s3, 80 }
  0x15   :  { %p652_p8 = scmp.ne.s32.totalorder %s896_s3, %s651_s9  ;;  %p655_p9 = scmp.lt.u32.totalorder %s651_s9, %s896_s3 }
  0x17   :  { %p657_p10 = pnand %p655_p9, %p652_p8 }
  0x19   :  { %660 = shalt.err (!%p657_p10)
}
  0x1a   :  { %s661_s14 = scalar_lea.vmem %s53_s21, 80  ;;  %s665_s15 = scalar_lea.vmem %s53_s21, 96 }
  0x1b   :  { %p662_p11 = scmp.ne.s32.totalorder %s53_s21, %s661_s14  ;;  %p666_p12 = scmp.lt.s32.totalorder %s53_s21, %s53_s21 }
  0x1c   :  { %p667_p13 = scmp.lt.s32.totalorder %s665_s15, %s661_s14 }
  0x1e   :  { %p668_p0 = por %p667_p13, %p666_p12 }
  0x20   :  { %p669_p1 = pnand %p668_p0, %p662_p11 }
  0x22   :  { %672 = shalt.err (!%p669_p1)
}
  0x23   :  { %55 = dma.hbm_to_vmem [thread:$0]  %s896_s3, 80, %s53_s21, [#allocation9]  }
  0x24   :  { %s771_s17 = smov [#allocation2]   ;;  %s772_s19 = smov [#allocation7]  }
  0x25   :  { %s20_s18 = sshll.u32 %s771_s17, 4  ;;  %s39_s20 = sshll.u32 %s772_s19, 4  ;;  %s21_s18 = int_to_ptr.vmem [resolvable:$true] %s20_s18  ;;  %s835_s20 = int_to_ptr.vmem [resolvable:$true] %s39_s20 }
  0x26   :  { %s673_s24 = scalar_lea.hbm %s893_s0, 128 }
  0x27   :  { %p674_p2 = scmp.ne.s32.totalorder %s893_s0, %s673_s24  ;;  %p677_p3 = scmp.lt.u32.totalorder %s673_s24, %s893_s0 }
  0x29   :  { %p679_p4 = pnand %p677_p3, %p674_p2 }
  0x2b   :  { %682 = shalt.err (!%p679_p4)
}
  0x2c   :  { %s683_s3 = scalar_lea.vmem %s21_s18, 128  ;;  %p688_p6 = scmp.lt.s32.totalorder %s21_s18, %s21_s18 }
  0x2d   :  { %p684_p5 = scmp.ne.s32.totalorder %s21_s18, %s683_s3  ;;  %p689_p7 = scmp.lt.s32.totalorder %s683_s3, %s683_s3 }
  0x2f   :  { %p690_p8 = por %p689_p7, %p688_p6 }
  0x31   :  { %p691_p9 = pnand %p690_p8, %p684_p5 }
  0x33   :  { %694 = shalt.err (!%p691_p9)
}
  0x34   :  { %23 = dma.hbm_to_vmem [thread:$0]  %s893_s0, 128, %s21_s18, [#allocation3]  }
  0x35   :  { %s695_s7 = scalar_lea.hbm %s895_s2, 10240 }
  0x36   :  { %p696_p10 = scmp.ne.s32.totalorder %s895_s2, %s695_s7  ;;  %p699_p11 = scmp.lt.u32.totalorder %s695_s7, %s895_s2 }
  0x38   :  { %p701_p12 = pnand %p699_p11, %p696_p10 }
  0x3a   :  { %704 = shalt.err (!%p701_p12)
}
  0x3b   :  { %s705_s12 = scalar_lea.vmem %s835_s20, 10240  ;;  %p710_p0 = scmp.lt.s32.totalorder %s835_s20, %s835_s20 }
  0x3c   :  { %p706_p13 = scmp.ne.s32.totalorder %s835_s20, %s705_s12  ;;  %p711_p1 = scmp.lt.s32.totalorder %s705_s12, %s705_s12 }
  0x3e   :  { %p712_p2 = por %p711_p1, %p710_p0 }
  0x40   :  { %p713_p3 = pnand %p712_p2, %p706_p13 }
  0x42   :  { %716 = shalt.err (!%p713_p3)
}
  0x43   :  { %s773_s0 = smov 640   ;;  %s774_s13 = smov 40  }
  0x44   :  { %45 = dma.hbm_to_vmem [thread:$0]  %s895_s2, 10240, %s835_s20, [#allocation6], %s773_s0, %s773_s0, %s774_s13  }
  0x45   :  { %s775_s1 = smov [#allocation10]   ;;  %s717_s19 = scalar_lea.hbm %s897_s4, 16 }
  0x46   :  { %s62_s16 = sshll.u32 %s775_s1, 4  ;;  %p718_p4 = scmp.ne.s32.totalorder %s897_s4, %s717_s19  ;;  %s63_s16 = int_to_ptr.vmem [resolvable:$true] %s62_s16 }
  0x47   :  { %p721_p5 = scmp.lt.u32.totalorder %s717_s19, %s897_s4 }
  0x49   :  { %p723_p6 = pnand %p721_p5, %p718_p4 }
  0x4b   :  { %726 = shalt.err (!%p723_p6)
}
  0x4c   :  { %s727_s26 = scalar_lea.vmem %s63_s16, 16  ;;  %s731_s2 = scalar_lea.vmem %s63_s16, 32 }
  0x4d   :  { %p728_p7 = scmp.ne.s32.totalorder %s63_s16, %s727_s26  ;;  %p732_p8 = scmp.lt.s32.totalorder %s63_s16, %s63_s16 }
  0x4e   :  { %p733_p9 = scmp.lt.s32.totalorder %s731_s2, %s727_s26 }
  0x50   :  { %p734_p10 = por %p733_p9, %p732_p8 }
  0x52   :  { %p735_p11 = pnand %p734_p10, %p728_p7 }
  0x54   :  { %738 = shalt.err (!%p735_p11)
}
  0x55   :  { %65 = dma.hbm_to_vmem [thread:$0]  %s897_s4, 16, %s63_s16, [#allocation9]  }
  0x56   :  { %761 = dma.done.wait [#allocation3], 128  }
  0x57   :  { %762 = vsyncadd [#allocation3], 4294967168 }
  0x58   :  { %763 = dma.done.wait [#allocation6], 10368  }
  0x59   :  { %764 = vsyncadd [#allocation6], 4294956928 }
  0x5a   :  { %765 = dma.done.wait [#allocation9], 96  }
  0x5b   :  { %766 = vsyncadd [#allocation9], 4294967200  ;;  %v776_v0 = vmov 0.0   ;;  %v83_v1 = vld [vmem:[#allocation7 + $0x8] sm:$0xff]  ;;  %v88_v2 = vld [vmem:[#allocation7 + $0x30] sm:$0xff]  ;;  %vm778_vm0 = vmmov 0  }
  0x5c   :  { %253 = vmatprep.mubr.f32.mxu0 %v776_v0  ;;  %324 = vmatprep.mubr.f32.mxu1 %v776_v0  ;;  %v82_v3 = vld [vmem:[#allocation7] sm:$0xff]  ;;  %v514_v4 = vpack.c.bf16 %v88_v2, %v83_v1  ;;  %v87_v5 = vld [vmem:[#allocation7 + $0x28] sm:$0xff]  ;;  %v93_v6 = vld [vmem:[#allocation7 + $0x58] sm:$0xff]  ;;  %s780_s4 = smov [#allocation11]  }
  0x5d   :  { %v98_v7 = vld [vmem:[#allocation7 + $0x80] sm:$0xff]  ;;  %v516_v8 = vpack.c.bf16 %v87_v5, %v82_v3  ;;  %v92_v10 = vld [vmem:[#allocation7 + $0x50] sm:$0xff]  ;;  %v97_v11 = vld [vmem:[#allocation7 + $0x78] sm:$0xff]  ;;  %s447_s28 = sshll.u32 %s780_s4, 4  ;;  %s448_s28 = int_to_ptr.vmem [resolvable:$true] %s447_s28 }
  0x5e   :  { %v518_v9 = vpack.c.bf16 %v98_v7, %v93_v6  ;;  %v103_v12 = vld [vmem:[#allocation7 + $0xa8] sm:$0xff]  ;;  %515 = vmatprep.subr.bf16.mxu0 %v514_v4  ;;  %v108_v13 = vld [vmem:[#allocation7 + $0xd0] sm:$0xff]  ;;  %v520_v14 = vpack.c.bf16 %v97_v11, %v92_v10  ;;  %v102_v15 = vld [vmem:[#allocation7 + $0xa0] sm:$0xff]  ;;  %s739_s3 = scalar_lea.vmem %s448_s28, 128  ;;  %p744_p13 = scmp.lt.s32.totalorder %s448_s28, %s448_s28 }
  0x5f   :  { %517 = vmatpush1.bf16.msra.mxu0 %v516_v8  ;;  %v107_v16 = vld [vmem:[#allocation7 + $0xc8] sm:$0xff]  ;;  %v522_v17 = vpack.c.bf16 %v108_v13, %v103_v12  ;;  %v113_v18 = vld [vmem:[#allocation7 + $0xf8] sm:$0xff]  ;;  %v90_v20 = vld [vmem:[#allocation7 + $0x40] sm:$0xff]  ;;  %p740_p12 = scmp.ne.s32.totalorder %s448_s28, %s739_s3  ;;  %p745_p0 = scmp.lt.s32.totalorder %s739_s3, %s739_s3 }
  0x60   :  { %519 = vmatprep.subr.bf16.mxu0 %v518_v9  ;;  %v85_v19 = vld [vmem:[#allocation7 + $0x18] sm:$0xff]  ;;  %v118_v21 = vld [vmem:[#allocation7 + $0x120] sm:$0xff]  ;;  %v84_v23 = vld [vmem:[#allocation7 + $0x10] sm:$0xff]  ;;  %v524_v26 = vpack.c.bf16 %v107_v16, %v102_v15 }
  0x61   :  { %v546_v22 = vpack.c.bf16 %v90_v20, %v85_v19  ;;  %v89_v24 = vld [vmem:[#allocation7 + $0x38] sm:$0xff]  ;;  %v95_v27 = vld [vmem:[#allocation7 + $0x68] sm:$0xff]  ;;  %v100_v28 = vld [vmem:[#allocation7 + $0x90] sm:$0xff]  ;;  %v526_v30 = vpack.c.bf16 %v118_v21, %v113_v18  ;;  %p746_p1 = por %p745_p0, %p744_p13 }
  0x62   :  { %v548_v25 = vpack.c.bf16 %v89_v24, %v84_v23  ;;  %v94_v29 = vld [vmem:[#allocation7 + $0x60] sm:$0xff]  ;;  %v112_v31 = vld [vmem:[#allocation7 + $0xf0] sm:$0xff]  ;;  %v117_v32 = vld [vmem:[#allocation7 + $0x118] sm:$0xff]  ;;  %v550_v33 = vpack.c.bf16 %v100_v28, %v95_v27 }
  0x63   :  { %521 = vmatpush1.bf16.msra.mxu0 %v520_v14  ;;  %547 = vmatprep.subr.bf16.mxu1 %v546_v22  ;;  %v99_v34 = vld [vmem:[#allocation7 + $0x88] sm:$0xff]  ;;  %v128_v36 = vld [vmem:[#allocation7 + $0x170] sm:$0xff]  ;;  %v105_v38 = vld [vmem:[#allocation7 + $0xb8] sm:$0xff]  ;;  %v528_v42 = vpack.c.bf16 %v117_v32, %v112_v31  ;;  %p747_p2 = pnand %p746_p1, %p740_p12 }
  0x64   :  { %523 = vmatprep.subr.bf16.mxu0 %v522_v17  ;;  %549 = vmatpush1.bf16.msra.mxu1 %v548_v25  ;;  %v123_v35 = vld [vmem:[#allocation7 + $0x148] sm:$0xff]  ;;  %v552_v37 = vpack.c.bf16 %v99_v34, %v94_v29  ;;  %v110_v39 = vld [vmem:[#allocation7 + $0xe0] sm:$0xff]  ;;  %v104_v40 = vld [vmem:[#allocation7 + $0xb0] sm:$0xff] }
  0x65   :  { %551 = vmatprep.subr.bf16.mxu1 %v550_v33  ;;  %v109_v41 = vld [vmem:[#allocation7 + $0xd8] sm:$0xff]  ;;  %v122_v43 = vld [vmem:[#allocation7 + $0x140] sm:$0xff]  ;;  %v127_v44 = vld [vmem:[#allocation7 + $0x168] sm:$0xff]  ;;  %v554_v45 = vpack.c.bf16 %v110_v39, %v105_v38  ;;  %v530_v46 = vpack.c.bf16 %v128_v36, %v123_v35 }
  0x66   :  { %v133_v47 = vld [vmem:[#allocation7 + $0x198] sm:$0xff]  ;;  %v556_v48 = vpack.c.bf16 %v109_v41, %v104_v40  ;;  %v115_v49 = vld [vmem:[#allocation7 + $0x108] sm:$0xff]  ;;  %v120_v50 = vld [vmem:[#allocation7 + $0x130] sm:$0xff]  ;;  %v532_v55 = vpack.c.bf16 %v127_v44, %v122_v43 }
  0x67   :  { %525 = vmatpush1.bf16.msra.mxu0 %v524_v26  ;;  %v138_v51 = vld [vmem:[#allocation7 + $0x1c0] sm:$0xff]  ;;  %v558_v52 = vpack.c.bf16 %v120_v50, %v115_v49  ;;  %v119_v54 = vld [vmem:[#allocation7 + $0x128] sm:$0xff]  ;;  %v125_v56 = vld [vmem:[#allocation7 + $0x158] sm:$0xff] }
  0x68   :  { %527 = vmatprep.subr.bf16.mxu0 %v526_v30  ;;  %553 = vmatpush1.bf16.msra.mxu1 %v552_v37  ;;  %v114_v53 = vld [vmem:[#allocation7 + $0x100] sm:$0xff]  ;;  %v534_v58 = vpack.c.bf16 %v138_v51, %v133_v47  ;;  %v132_v59 = vld [vmem:[#allocation7 + $0x190] sm:$0xff]  ;;  %v137_v60 = vld [vmem:[#allocation7 + $0x1b8] sm:$0xff]  ;;  %v777_v37 = vmov 0.0|0.0  }
  0x69   :  { %555 = vmatprep.subr.bf16.mxu1 %v554_v45  ;;  %v130_v57 = vld [vmem:[#allocation7 + $0x180] sm:$0xff]  ;;  %v143_v61 = vld [vmem:[#allocation7 + $0x1e8] sm:$0xff]  ;;  %v560_v62 = vpack.c.bf16 %v119_v54, %v114_v53  ;;  %v148_v63 = vld [vmem:[#allocation7 + $0x210] sm:$0xff]  ;;  %v536_v6 = vpack.c.bf16 %v137_v60, %v132_v59  ;;  %v779_v59 = vmov 0   ;;  %v164_v60 = vlaneseq }
  0x6a   :  { %v562_v1 = vpack.c.bf16 %v130_v57, %v125_v56  ;;  %v124_v2 = vld [vmem:[#allocation7 + $0x150] sm:$0xff]  ;;  %v129_v3 = vld [vmem:[#allocation7 + $0x178] sm:$0xff]  ;;  %v135_v4 = vld [vmem:[#allocation7 + $0x1a8] sm:$0xff]  ;;  %v538_v7 = vpack.c.bf16 %v148_v63, %v143_v61  ;;  %614 = vset.pattern.permute.xlu0 %v779_v59 }
  0x6b   :  { %529 = vmatpush1.bf16.msra.mxu0 %v528_v42  ;;  %v140_v5 = vld [vmem:[#allocation7 + $0x1d0] sm:$0xff]  ;;  %v142_v8 = vld [vmem:[#allocation7 + $0x1e0] sm:$0xff]  ;;  %v147_v9 = vld [vmem:[#allocation7 + $0x208] sm:$0xff]  ;;  %v564_v11 = vpack.c.bf16 %v129_v3, %v124_v2  ;;  %v165_v61 = vshrl.u32 %v164_v60, 7 }
  0x6c   :  { %531 = vmatprep.subr.bf16.mxu0 %v530_v46  ;;  %557 = vmatpush1.bf16.msra.mxu1 %v556_v48  ;;  %v153_v10 = vld [vmem:[#allocation7 + $0x238] sm:$0xff]  ;;  %v158_v12 = vld [vmem:[#allocation7 + $0x260] sm:$0xff]  ;;  %v566_v13 = vpack.c.bf16 %v140_v5, %v135_v4  ;;  %v139_v15 = vld [vmem:[#allocation7 + $0x1c8] sm:$0xff]  ;;  %v540_v18 = vpack.c.bf16 %v147_v9, %v142_v8 }
  0x6d   :  { %559 = vmatprep.subr.bf16.mxu1 %v558_v52  ;;  %v134_v14 = vld [vmem:[#allocation7 + $0x1a0] sm:$0xff]  ;;  %v145_v16 = vld [vmem:[#allocation7 + $0x1f8] sm:$0xff]  ;;  %v542_v19 = vpack.c.bf16 %v158_v12, %v153_v10  ;;  %v152_v20 = vld [vmem:[#allocation7 + $0x230] sm:$0xff]  ;;  %v174_v2 = vsub.s32 2, %v165_v61 }
  0x6e   :  { %v150_v17 = vld [vmem:[#allocation7 + $0x220] sm:$0xff]  ;;  %v157_v21 = vld [vmem:[#allocation7 + $0x258] sm:$0xff]  ;;  %v568_v22 = vpack.c.bf16 %v139_v15, %v134_v14  ;;  %v144_v24 = vld [vmem:[#allocation7 + $0x1f0] sm:$0xff]  ;;  %v178_v14 = vsub.s32 3, %v165_v61 }
  0x6f   :  { %533 = vmatpush1.bf16.msra.mxu0 %v532_v55  ;;  %v570_v23 = vpack.c.bf16 %v150_v17, %v145_v16  ;;  %v149_v25 = vld [vmem:[#allocation7 + $0x218] sm:$0xff]  ;;  %v155_v26 = vld [vmem:[#allocation7 + $0x248] sm:$0xff]  ;;  %v160_v27 = vld [vmem:[#allocation7 + $0x270] sm:$0xff]  ;;  %v544_v28 = vpack.c.bf16 %v157_v21, %v152_v20 }
  0x70   :  { %535 = vmatprep.subr.bf16.mxu0 %v534_v58  ;;  %561 = vmatpush1.bf16.msra.mxu1 %v560_v62  ;;  %v86_v29 = vld [vmem:[#allocation7 + $0x20] sm:$0xff]  ;;  %v91_v30 = vld [vmem:[#allocation7 + $0x48] sm:$0xff]  ;;  %v572_v31 = vpack.c.bf16 %v149_v25, %v144_v24  ;;  %v574_v32 = vpack.c.bf16 %v160_v27, %v155_v26  ;;  %v81_v35 = vld [vmem:[#allocation2] sm:$0xff]  ;;  %v170_v62 = vsub.s32 1, %v165_v61 }
  0x71   :  { %563 = vmatprep.subr.bf16.mxu1 %v562_v1  ;;  %v154_v33 = vld [vmem:[#allocation7 + $0x240] sm:$0xff]  ;;  %v159_v34 = vld [vmem:[#allocation7 + $0x268] sm:$0xff]  ;;  %v579_v36 = vpack.c.bf16 %v91_v30, %v86_v29  ;;  %v96_v38 = vld [vmem:[#allocation7 + $0x70] sm:$0xff]  ;;  %v166_v29 = vsub.s32 0, %v165_v61 }
  0x72   :  { %v101_v39 = vld [vmem:[#allocation7 + $0x98] sm:$0xff]  ;;  %v576_v40 = vpack.c.bf16 %v159_v34, %v154_v33  ;;  %v106_v42 = vld [vmem:[#allocation7 + $0xc0] sm:$0xff]  ;;  %v111_v43 = vld [vmem:[#allocation7 + $0xe8] sm:$0xff] }
  0x73   :  { %537 = vmatpush1.bf16.msra.mxu0 %v536_v6  ;;  %v582_v41 = vpack.c.bf16 %v101_v39, %v96_v38  ;;  %v585_v44 = vpack.c.bf16 %v111_v43, %v106_v42  ;;  %v116_v45 = vld [vmem:[#allocation7 + $0x110] sm:$0xff]  ;;  %v121_v46 = vld [vmem:[#allocation7 + $0x138] sm:$0xff]  ;;  %v126_v48 = vld [vmem:[#allocation7 + $0x160] sm:$0xff] }
  0x74   :  { %539 = vmatprep.subr.bf16.mxu0 %v538_v7  ;;  %565 = vmatpush1.bf16.msra.mxu1 %v564_v11  ;;  %v588_v47 = vpack.c.bf16 %v121_v46, %v116_v45  ;;  %v131_v49 = vld [vmem:[#allocation7 + $0x188] sm:$0xff]  ;;  %v136_v51 = vld [vmem:[#allocation7 + $0x1b0] sm:$0xff]  ;;  %v146_v53 = vld [vmem:[#allocation7 + $0x200] sm:$0xff] }
  0x75   :  { %567 = vmatprep.subr.bf16.mxu1 %v566_v13  ;;  %v591_v50 = vpack.c.bf16 %v131_v49, %v126_v48  ;;  %v151_v54 = vld [vmem:[#allocation7 + $0x228] sm:$0xff]  ;;  %v156_v56 = vld [vmem:[#allocation7 + $0x250] sm:$0xff]  ;;  %v161_v57 = vld [vmem:[#allocation7 + $0x278] sm:$0xff] }
  0x76   :  { %v597_v55 = vpack.c.bf16 %v151_v54, %v146_v53  ;;  %v600_v58 = vpack.c.bf16 %v161_v57, %v156_v56  ;;  %v162_v63 = vld [vmem:[#allocation8] sm:$0x1f] }
  0x77   :  { %541 = vmatpush1.bf16.msra.mxu0 %v540_v18  ;;  %v171_v1 = vrot.slane %v162_v63, %v170_v62  ;;  %v175_v6 = vrot.slane %v162_v63, %v174_v2  ;;  %v179_v17 = vrot.slane %v162_v63, %v178_v14  ;;  %v182_v18 = vsub.s32 4, %v165_v61 }
  0x78   :  { %543 = vmatprep.subr.bf16.mxu0 %v542_v19  ;;  %569 = vmatpush1.bf16.msra.mxu1 %v568_v22  ;;  %v460_v19 = vld [vmem:[#allocation10] ss:$0 sm:$0xff] }
  0x79   :  { %571 = vmatprep.subr.bf16.mxu1 %v570_v23  ;;  %v183_v22 = vrot.slane %v162_v63, %v182_v18 }
  0x7b   :  { %545 = vmatpush1.bf16.msra.mxu0 %v544_v28 }
  0x7c   :  { %578 = vmatprep.subr.bf16.mxu0 %v777_v37  ;;  %573 = vmatpush1.bf16.msra.mxu1 %v572_v31  ;;  %v167_v31 = vrot.slane %v162_v63, %v166_v29 }
  0x7d   :  { %575 = vmatprep.subr.bf16.mxu1 %v574_v32 }
  0x7e   :  { %254 = vmatmul.mubr.f32.vlgmr.msra.gmra.mrb[0].mxu0 %v81_v35 }
  0x7f   :  { %580 = vmatpush3.bf16.msra.mxu0 %v579_v36  ;;  %511 = vmatprep.mubr.msk.f32.mxu0 %vm778_vm0, %v776_v0  ;;  %v141_v0 = vld [vmem:[#allocation7 + $0x1d8] sm:$0xff] }
  0x80   :  { %581 = vmatprep.subr.bf16.mxu0 %v777_v37  ;;  %577 = vmatpush1.bf16.msra.mxu1 %v576_v40  ;;  %v594_v52 = vpack.c.bf16 %v141_v0, %v136_v51  ;;  %v438_v40 = vld [vmem:[#allocation5] sm:$0xff] }
  0x83   :  { %583 = vmatpush3.bf16.msra.mxu0 %v582_v41  ;;  %325 = vmatmul.mubr.f32.vlgmr.msra.gmra.mrb[0].mxu1 %v81_v35 }
  0x84   :  { %584 = vmatprep.subr.bf16.mxu0 %v777_v37 }
  0x87   :  { %586 = vmatpush3.bf16.msra.mxu0 %v585_v44 }
  0x88   :  { %587 = vmatprep.subr.bf16.mxu0 %v777_v37 }
  0x8b   :  { %589 = vmatpush3.bf16.msra.mxu0 %v588_v47 }
  0x8c   :  { %590 = vmatprep.subr.bf16.mxu0 %v777_v37 }
  0x8f   :  { %592 = vmatpush3.bf16.msra.mxu0 %v591_v50 }
  0x90   :  { %593 = vmatprep.subr.bf16.mxu0 %v777_v37 }
  0x93   :  { %595 = vmatpush3.bf16.msra.mxu0 %v594_v52 }
  0x94   :  { %596 = vmatprep.subr.bf16.mxu0 %v777_v37 }
  0x97   :  { %598 = vmatpush3.bf16.msra.mxu0 %v597_v55 }
  0x98   :  { %599 = vmatprep.subr.bf16.mxu0 %v777_v37 }
  0x9b   :  { %601 = vmatpush3.bf16.msra.mxu0 %v600_v58 }
  0x9e   :  { %512 = vmatmul.mubr.f32.vlgmr.msra.gmra.mrb[2].mxu0 %v81_v35 }
 0x151   :  { %v255_v3 = vpop.f32.mrb[0].mxu0 }
 0x152   :  { %v257_v4 = vpop.f32.mrb[1].mxu0  ;;  %v256_v34 = vadd.f32 %v255_v3, %v167_v31 }
 0x153   :  { %v258_v5 = vadd.f32 %v257_v4, %v171_v1 }
 0x155   :  { %v458_v7 = vmul.f32 -1.442695, %v258_v5 }
 0x156   :  { %v326_v8 = vpop.f32.mrb[0].mxu1 }
 0x157   :  { %615 = vpow2.f32 %v458_v7  ;;  %v327_v9 = vadd.f32 %v326_v8, %v175_v6  ;;  %v328_v10 = vpop.f32.mrb[1].mxu1 }
 0x158   :  { %v329_v20 = vadd.f32 %v328_v10, %v179_v17 }
 0x159   :  { %v459_v11 = vmul.f32 -1.442695, %v327_v9 }
 0x15b   :  { %617 = vpow2.f32 %v459_v11 }
 0x161   :  { %v616_v12 = vpop.eup %615 }
 0x162   :  { %v404_v13 = vadd.f32 1.0, %v616_v12 }
 0x164   :  { %619 = vrcp.f32 %v404_v13 }
 0x165   :  { %v618_v15 = vpop.eup %617 }
 0x166   :  { %v410_v16 = vadd.f32 1.0, %v618_v15 }
 0x168   :  { %621 = vrcp.f32 %v410_v16 }
 0x16e   :  { %v620_v21 = vpop.eup %619 }
 0x16f   :  { %v420_v23 = vmul.f32 %v620_v21, %v460_v19 }
 0x171   :  { %v421_v24 = vadd.f32 %v420_v23, %v329_v20  ;;  %v397_v25 = vpop.f32.mrb[2].mxu0 }
 0x172   :  { %v398_v26 = vadd.f32 %v397_v25, %v183_v22  ;;  %v513_v27 = vpop.f32.mrb[3].mxu0  ;;  %v622_v30 = vpop.eup %621 }
 0x173   :  { %623 = vtanh.f32 %v421_v24  ;;  %v423_v32 = vsub.f32 1.0, %v622_v30 }
 0x174   :  { %v461_v28 = vmul.f32 -1.442695, %v398_v26 }
 0x176   :  { %625 = vpow2.f32 %v461_v28 }
 0x17d   :  { %v624_v33 = vpop.eup %623 }
 0x17e   :  { %v424_v35 = vmul.f32 %v624_v33, %v423_v32 }
 0x180   :  { %v626_v36 = vpop.eup %625  ;;  %v431_v37 = vadd.f32 %v424_v35, %v256_v34 }
 0x181   :  { %v428_v38 = vadd.f32 1.0, %v626_v36 }
 0x183   :  { %627 = vrcp.f32 %v428_v38 }
 0x18d   :  { %v628_v39 = vpop.eup %627 }
 0x18e   :  { %434 = vperm.xlu0 %614, %v628_v39  }
 0x20d   :  { %v435_v41 = vpop.permute.xlu0 %434 }
 0x20e   :  { %v437_v42 = vadd.f32 %v435_v41, %v431_v37 }
 0x210   :  { %v439_v43 = vadd.f32 %v438_v40, %v437_v42 }
 0x212   :  { %440 = vst [vmem:[#allocation11] sm:$0xff] %v439_v43 }
 0x213   :  { %750 = shalt.err (!%p747_p2)
}
 0x214   :  { %s751_s30 = scalar_lea.hbm %s898_s5, 128 }
 0x215   :  { %p752_p3 = scmp.ne.s32.totalorder %s898_s5, %s751_s30  ;;  %p755_p4 = scmp.lt.u32.totalorder %s751_s30, %s898_s5 }
 0x217   :  { %p757_p5 = pnand %p755_p4, %p752_p3 }
 0x219   :  { %760 = shalt.err (!%p757_p5)
}
 0x21a   :  { %450 = dma.vmem_to_hbm [thread:$0]  %s448_s28, 128, %s898_s5, [#allocation4]  }
 0x21b   :  { %767 = dma.done.wait [#allocation4], 128  }
 0x21c   :  { %768 = vsyncadd [#allocation4], 4294967168 }
 0x21d   :  { %454 = vsyncpa [#allocation3], 1 }
 0x21e   :  { %455 = vsyncpa [#allocation6], 1 }
 0x21f   :  { %456 = vsyncpa [#allocation9], 1 }
 0x220   :  { %457 = vsyncpa [#allocation4], 1 }

</bundles_post_ra>
